<compile_context>
chip_gen: v7x
topology: tpu7x:2x2x1
jax: 0.10.0
libtpu: 0.0.40
codegen_flags: <defaults>
</compile_context>

<pallas_src>
import math

import jax
import jax.numpy as jnp
from jax.experimental import pallas as pl
from jax.experimental.pallas import tpu as pltpu


def _layernorm(h, gamma, eps=1e-5):
    # f32 statistics (kept in f32 even though matmul operands are bf16)
    mu = jnp.mean(h, axis=-1, keepdims=True)
    var = jnp.mean((h - mu) ** 2, axis=-1, keepdims=True)
    return (h - mu) * jax.lax.rsqrt(var + eps) * gamma      # gamma (1, C) broadcasts over rows


def block_kernel(xq_ref, xf_ref, g1_ref, wqh_ref, wkvh_ref, wprojh_ref,
                 g2_ref, wfc_ref, wmlp_ref, o_ref):
    f32, bf16 = jnp.float32, jnp.bfloat16

    xq = xq_ref[0]                       # (TQ, C) query-tile rows of this batch element
    xf = xf_ref[0]                       # (T,  C) full sequence (source of K/V)
    TQ, C = xq.shape
    T = xf.shape[0]
    H, _, D = wqh_ref.shape              # heads, C, head_dim
    scale = 1.0 / math.sqrt(D)
    q0 = pl.program_id(1) * TQ           # global row offset of this query tile

    g1 = g1_ref[...]
    g2 = g2_ref[...]

    # ---------------- attention branch: xq + attn(ln_1(x))[tile] ----------------
    hq = _layernorm(xq, g1)              # f32
    hf = _layernorm(xf, g1)

    # Head-batched projections: Q from the query tile, K/V from the full sequence.
    # All matmuls are batched MXU dot_generals with bf16 operands / f32 accumulation;
    # no per-head lane slicing, no concat, no in-kernel transpose.
    hq_b = jnp.broadcast_to(hq.astype(bf16)[None], (H, TQ, C))
    hf_b = jnp.broadcast_to(hf.astype(bf16)[None], (H, T, C))
    q3 = jnp.einsum('hrc,hcd->hrd', hq_b, wqh_ref[...], preferred_element_type=f32)    # (H,TQ,D)
    kv = jnp.einsum('hrc,hcd->hrd', hf_b, wkvh_ref[...], preferred_element_type=f32)   # (H,T,2D)
    k3 = kv[:, :, :D]
    v3 = kv[:, :, D:]

    qs = (q3 * scale).astype(bf16)       # scale in f32, then cast
    s = jnp.einsum('hqd,hkd->hqk', qs, k3.astype(bf16), preferred_element_type=f32)    # (H,TQ,T)

    rows = q0 + jax.lax.broadcasted_iota(jnp.int32, (TQ, T), 0)
    cols = jax.lax.broadcasted_iota(jnp.int32, (TQ, T), 1)
    causal = (cols <= rows)[None]        # (1, TQ, T); hoisted, built once per grid step
    s = jnp.where(causal, s, -jnp.inf)

    s = s - jnp.max(s, axis=-1, keepdims=True)                 # f32 softmax stats
    p = jnp.exp(s)
    inv = pl.reciprocal(jnp.sum(p, axis=-1, keepdims=True), approx=True)   # EUP, off the VALU slot
    p = p * inv

    z = jnp.einsum('hqk,hkd->hqd', p.astype(bf16), v3.astype(bf16),
                   preferred_element_type=f32)                             # (H,TQ,D)
    zp = jnp.einsum('hqd,hdc->hqc', z.astype(bf16), wprojh_ref[...],
                    preferred_element_type=f32)                            # (H,TQ,C)
    attn = zp[0]                          # head reduction: H-1 cheap VPU adds (static unroll)
    for hh in range(1, H):
        attn = attn + zp[hh]

    x1 = xq + attn

    # ---------------- MLP branch: x1 + mlp(ln_2(x1)) ----------------
    h2 = _layernorm(x1, g2)
    fc = jnp.dot(h2.astype(bf16), wfc_ref[...], preferred_element_type=f32)        # (TQ, 4C)
    # exact erf GELU (PyTorch F.gelu default); tanh-approx would offload to EUP but changes numerics
    gelu = 0.5 * fc * (1.0 + jax.lax.erf(fc * (1.0 / math.sqrt(2.0))))
    mlp = jnp.dot(gelu.astype(bf16), wmlp_ref[...], preferred_element_type=f32)    # (TQ, C)

    o_ref[0] = (x1 + mlp).astype(o_ref.dtype)


def block_forward(x, params, heads, q_tile=None):
    B, T, C = x.shape
    assert C % heads == 0
    D = C // heads
    g1, wqkv, wproj, g2, wfc, wmlp = params
    bf16 = jnp.bfloat16

    if q_tile is None:
        q_tile = min(T, 128)
    assert T % q_tile == 0, "q_tile must divide T"
    nq = T // q_tile

    # Pre-arrange weights head-major (cheap one-time XLA transposes, outside the kernel) and
    # store them in bf16: halves VMEM residency of the (double-buffered) weight blocks and
    # halves their HBM traffic; MXU runs at its bf16 rate.
    wq = wqkv[:, :C].reshape(C, heads, D).transpose(1, 0, 2)           # (H, C, D)
    wk = wqkv[:, C:2 * C].reshape(C, heads, D).transpose(1, 0, 2)
    wv = wqkv[:, 2 * C:].reshape(C, heads, D).transpose(1, 0, 2)
    wq_h = wq.astype(bf16)
    wkv_h = jnp.concatenate([wk, wv], axis=-1).astype(bf16)            # (H, C, 2D)
    wproj_h = wproj.reshape(heads, D, C).astype(bf16)                  # (H, D, C)
    wfc_b = wfc.astype(bf16)
    wmlp_b = wmlp.astype(bf16)

    # Explicit VMEM budget (the default scoped limit is 16/32 MiB and is easy to blow past with
    # fully resident weights at realistic C). Rough: 2x (double-buffered) blocks + temporaries.
    w_block_bytes = 2 * (heads * C * D + heads * C * 2 * D + heads * D * C
                         + C * 4 * C + 4 * C * C) + 4 * 2 * C
    x_block_bytes = 4 * (q_tile * C + T * C + q_tile * C)
    tmp_bytes = (2 * heads * T * C                   # bf16 broadcast activations
                 + 4 * heads * T * 2 * D             # kv (f32)
                 + 4 * heads * q_tile * T * 2        # scores + probs (f32)
                 + 4 * heads * q_tile * (D + C)      # z + per-head proj (f32)
                 + 4 * q_tile * 4 * C * 2)           # fc + gelu (f32)
    vmem_bytes = int(min(64 * 2 ** 20,
                         max(16 * 2 ** 20, 2 * (w_block_bytes + x_block_bytes) + tmp_bytes)))

    cost = pl.CostEstimate(
        flops=int(2 * B * T * 12 * C * C + 4 * B * T * T * C),
        transcendentals=int(B * T * (heads * T + 4 * C)),
        bytes_accessed=int(2 * 12 * C * C + 3 * B * T * C * 4),
    )

    return pl.pallas_call(
        block_kernel,
        out_shape=jax.ShapeDtypeStruct((B, T, C), x.dtype),
        grid=(B, nq),
        in_specs=[
            pl.BlockSpec((1, q_tile, C), lambda b, q: (b, q, 0)),      # x: query tile
            pl.BlockSpec((1, T, C), lambda b, q: (b, 0, 0)),           # x: full sequence (K/V)
            pl.BlockSpec((1, C), lambda b, q: (0, 0)),                 # ln_1 gamma
            pl.BlockSpec((heads, C, D), lambda b, q: (0, 0, 0)),       # Wq  (head-major, bf16)
            pl.BlockSpec((heads, C, 2 * D), lambda b, q: (0, 0, 0)),   # [Wk|Wv] (head-major, bf16)
            pl.BlockSpec((heads, D, C), lambda b, q: (0, 0, 0)),       # attn c_proj (head-major)
            pl.BlockSpec((1, C), lambda b, q: (0, 0)),                 # ln_2 gamma
            pl.BlockSpec((C, 4 * C), lambda b, q: (0, 0)),             # mlp c_fc (bf16)
            pl.BlockSpec((4 * C, C), lambda b, q: (0, 0)),             # mlp c_proj (bf16)
        ],
        out_specs=pl.BlockSpec((1, q_tile, C), lambda b, q: (b, q, 0)),
        compiler_params=pltpu.CompilerParams(
            dimension_semantics=("parallel", "parallel"),
            vmem_limit_bytes=vmem_bytes),
        cost_estimate=cost,
    )(x, x, g1, wq_h, wkv_h, wproj_h, g2, wfc_b, wmlp_b)


def reference_forward(x, params, heads):
    """Pure-JAX reference with the same bf16 casting points as the kernel."""
    g1, wqkv, wproj, g2, wfc, wmlp = params
    B, T, C = x.shape
    D = C // heads
    bf16, f32 = jnp.bfloat16, jnp.float32

    def ln(h, g):
        mu = jnp.mean(h, -1, keepdims=True)
        var = jnp.mean((h - mu) ** 2, -1, keepdims=True)
        return (h - mu) * jax.lax.rsqrt(var + 1e-5) * g

    h = ln(x, g1)
    qkv = jnp.einsum('btc,cf->btf', h.astype(bf16), wqkv.astype(bf16),
                     preferred_element_type=f32)
    q, k, v = jnp.split(qkv, 3, axis=-1)
    q = q.reshape(B, T, heads, D).transpose(0, 2, 1, 3)
    k = k.reshape(B, T, heads, D).transpose(0, 2, 1, 3)
    v = v.reshape(B, T, heads, D).transpose(0, 2, 1, 3)
    q = (q / math.sqrt(D)).astype(bf16)
    att = jnp.einsum('bhtd,bhsd->bhts', q, k.astype(bf16), preferred_element_type=f32)
    mask = jnp.tril(jnp.ones((T, T), bool))
    att = jnp.where(mask, att, -jnp.inf)
    att = jax.nn.softmax(att, axis=-1)
    z = jnp.einsum('bhts,bhsd->bhtd', att.astype(bf16), v.astype(bf16),
                   preferred_element_type=f32)
    z = z.transpose(0, 2, 1, 3).reshape(B, T, C)
    x1 = x + jnp.einsum('btc,cf->btf', z.astype(bf16), wproj.astype(bf16),
                        preferred_element_type=f32)
    h2 = ln(x1, g2)
    fc = jnp.einsum('btc,cf->btf', h2.astype(bf16), wfc.astype(bf16),
                    preferred_element_type=f32)
    gelu = 0.5 * fc * (1.0 + jax.lax.erf(fc / math.sqrt(2.0)))
    mlp = jnp.einsum('btc,cf->btf', gelu.astype(bf16), wmlp.astype(bf16),
                     preferred_element_type=f32)
    return x1 + mlp


def init_params(key, dim):
    ks = jax.random.split(key, 4)
    std = 0.02
    g1 = jnp.ones((1, dim), jnp.float32)        # LayerNorm weight (init = ones), no bias
    g2 = jnp.ones((1, dim), jnp.float32)
    wqkv = (jax.random.normal(ks[0], (dim, 3 * dim)) * std).astype(jnp.float32)
    wproj = (jax.random.normal(ks[1], (dim, dim)) * std).astype(jnp.float32)
    wfc = (jax.random.normal(ks[2], (dim, 4 * dim)) * std).astype(jnp.float32)
    wmlp = (jax.random.normal(ks[3], (4 * dim, dim)) * std).astype(jnp.float32)
    return g1, wqkv, wproj, g2, wfc, wmlp


if __name__ == "__main__":
    B, T, dim, heads = 2, 8, 32, 4
    key = jax.random.PRNGKey(0)
    kx, kp = jax.random.split(key)
    x = jax.random.normal(kx, (B, T, dim), dtype=jnp.float32)
    params = init_params(kp, dim)

    out = jax.block_until_ready(block_forward(x, params, heads))
    ref = reference_forward(x, params, heads)

    assert out.shape == (B, T, dim)
    # bf16 matmul operands + EUP approx reciprocal -> small, bounded deviation vs. reference
    assert jnp.allclose(out, ref, atol=2e-3, rtol=2e-3), \
        f"Pallas kernel mismatch vs reference (max abs err {float(jnp.max(jnp.abs(out - ref)))})"

    print("KERNEL_OK")
</pallas_src>

<mosaic_0001>
module attributes {stable_mosaic.version = 11 : i64} {
  func.func @block_kernel(%arg0: i32, %arg1: i32, %arg2: memref<1x8x32xf32, #tpu.memory_space<vmem>>, %arg3: memref<1x8x32xf32, #tpu.memory_space<vmem>>, %arg4: memref<1x32xf32, #tpu.memory_space<vmem>>, %arg5: memref<4x32x8xbf16, #tpu.memory_space<vmem>>, %arg6: memref<4x32x16xbf16, #tpu.memory_space<vmem>>, %arg7: memref<4x8x32xbf16, #tpu.memory_space<vmem>>, %arg8: memref<1x32xf32, #tpu.memory_space<vmem>>, %arg9: memref<32x128xbf16, #tpu.memory_space<vmem>>, %arg10: memref<128x32xbf16, #tpu.memory_space<vmem>>, %arg11: memref<1x8x32xf32, #tpu.memory_space<vmem>>) attributes {dimension_semantics = [#tpu.dimension_semantics<parallel>, #tpu.dimension_semantics<parallel>], iteration_bounds = array<i64: 2, 1>, scalar_prefetch = 0 : i64, scratch_operands = 0 : i64, tpu.core_type = #tpu.core_type<tc>, window_params = [{transform_indices = @transform_0, window_bounds = array<i64: 1, 8, 32>}, {transform_indices = @transform_1, window_bounds = array<i64: 1, 8, 32>}, {pipeline_mode = #tpu.pipeline_mode<synchronous>, transform_indices = @transform_2, window_bounds = array<i64: 1, 32>}, {pipeline_mode = #tpu.pipeline_mode<synchronous>, transform_indices = @transform_3, window_bounds = array<i64: 4, 32, 8>}, {pipeline_mode = #tpu.pipeline_mode<synchronous>, transform_indices = @transform_4, window_bounds = array<i64: 4, 32, 16>}, {pipeline_mode = #tpu.pipeline_mode<synchronous>, transform_indices = @transform_5, window_bounds = array<i64: 4, 8, 32>}, {pipeline_mode = #tpu.pipeline_mode<synchronous>, transform_indices = @transform_6, window_bounds = array<i64: 1, 32>}, {pipeline_mode = #tpu.pipeline_mode<synchronous>, transform_indices = @transform_7, window_bounds = array<i64: 32, 128>}, {pipeline_mode = #tpu.pipeline_mode<synchronous>, transform_indices = @transform_8, window_bounds = array<i64: 128, 32>}, {transform_indices = @transform_9, window_bounds = array<i64: 1, 8, 32>}]} {
    %c0 = arith.constant 0 : index
    %c0_0 = arith.constant 0 : index
    %c0_1 = arith.constant 0 : index
    %0 = vector.load %arg2[%c0, %c0_0, %c0_1] : memref<1x8x32xf32, #tpu.memory_space<vmem>>, vector<1x8x32xf32>
    %1 = vector.shape_cast %0 : vector<1x8x32xf32> to vector<8x32xf32>
    %c0_2 = arith.constant 0 : index
    %c0_3 = arith.constant 0 : index
    %c0_4 = arith.constant 0 : index
    %2 = vector.load %arg3[%c0_2, %c0_3, %c0_4] : memref<1x8x32xf32, #tpu.memory_space<vmem>>, vector<1x8x32xf32>
    %3 = vector.shape_cast %2 : vector<1x8x32xf32> to vector<8x32xf32>
    %c8_i32 = arith.constant 8 : i32
    %4 = arith.muli %arg1, %c8_i32 : i32
    %c0_5 = arith.constant 0 : index
    %c0_6 = arith.constant 0 : index
    %5 = vector.load %arg4[%c0_5, %c0_6] : memref<1x32xf32, #tpu.memory_space<vmem>>, vector<1x32xf32>
    %c0_7 = arith.constant 0 : index
    %c0_8 = arith.constant 0 : index
    %6 = vector.load %arg8[%c0_7, %c0_8] : memref<1x32xf32, #tpu.memory_space<vmem>>, vector<1x32xf32>
    %cst = arith.constant dense<0.000000e+00> : vector<8xf32>
    %7 = vector.multi_reduction <add>, %1, %cst [1] : vector<8x32xf32> to vector<8xf32>
    %8 = vector.shape_cast %7 : vector<8xf32> to vector<8x1xf32>
    %cst_9 = arith.constant 3.200000e+01 : f32
    %9 = vector.broadcast %cst_9 : f32 to vector<8x1xf32>
    %10 = arith.divf %8, %9 : vector<8x1xf32>
    %11 = vector.broadcast %10 : vector<8x1xf32> to vector<8x32xf32>
    %12 = arith.subf %1, %11 : vector<8x32xf32>
    %13 = arith.mulf %12, %12 : vector<8x32xf32>
    %cst_10 = arith.constant dense<0.000000e+00> : vector<8xf32>
    %14 = vector.multi_reduction <add>, %13, %cst_10 [1] : vector<8x32xf32> to vector<8xf32>
    %15 = vector.shape_cast %14 : vector<8xf32> to vector<8x1xf32>
    %cst_11 = arith.constant 3.200000e+01 : f32
    %16 = vector.broadcast %cst_11 : f32 to vector<8x1xf32>
    %17 = arith.divf %15, %16 : vector<8x1xf32>
    %18 = vector.broadcast %10 : vector<8x1xf32> to vector<8x32xf32>
    %19 = arith.subf %1, %18 : vector<8x32xf32>
    %cst_12 = arith.constant 9.99999974E-6 : f32
    %20 = vector.broadcast %cst_12 : f32 to vector<8x1xf32>
    %21 = arith.addf %17, %20 : vector<8x1xf32>
    %22 = math.rsqrt %21 : vector<8x1xf32>
    %23 = vector.broadcast %22 : vector<8x1xf32> to vector<8x32xf32>
    %24 = arith.mulf %19, %23 : vector<8x32xf32>
    %25 = vector.broadcast %5 : vector<1x32xf32> to vector<8x32xf32>
    %26 = arith.mulf %24, %25 : vector<8x32xf32>
    %cst_13 = arith.constant dense<0.000000e+00> : vector<8xf32>
    %27 = vector.multi_reduction <add>, %3, %cst_13 [1] : vector<8x32xf32> to vector<8xf32>
    %28 = vector.shape_cast %27 : vector<8xf32> to vector<8x1xf32>
    %cst_14 = arith.constant 3.200000e+01 : f32
    %29 = vector.broadcast %cst_14 : f32 to vector<8x1xf32>
    %30 = arith.divf %28, %29 : vector<8x1xf32>
    %31 = vector.broadcast %30 : vector<8x1xf32> to vector<8x32xf32>
    %32 = arith.subf %3, %31 : vector<8x32xf32>
    %33 = arith.mulf %32, %32 : vector<8x32xf32>
    %cst_15 = arith.constant dense<0.000000e+00> : vector<8xf32>
    %34 = vector.multi_reduction <add>, %33, %cst_15 [1] : vector<8x32xf32> to vector<8xf32>
    %35 = vector.shape_cast %34 : vector<8xf32> to vector<8x1xf32>
    %cst_16 = arith.constant 3.200000e+01 : f32
    %36 = vector.broadcast %cst_16 : f32 to vector<8x1xf32>
    %37 = arith.divf %35, %36 : vector<8x1xf32>
    %38 = vector.broadcast %30 : vector<8x1xf32> to vector<8x32xf32>
    %39 = arith.subf %3, %38 : vector<8x32xf32>
    %cst_17 = arith.constant 9.99999974E-6 : f32
    %40 = vector.broadcast %cst_17 : f32 to vector<8x1xf32>
    %41 = arith.addf %37, %40 : vector<8x1xf32>
    %42 = math.rsqrt %41 : vector<8x1xf32>
    %43 = vector.broadcast %42 : vector<8x1xf32> to vector<8x32xf32>
    %44 = arith.mulf %39, %43 : vector<8x32xf32>
    %45 = vector.broadcast %5 : vector<1x32xf32> to vector<8x32xf32>
    %46 = arith.mulf %44, %45 : vector<8x32xf32>
    %47 = arith.truncf %26 : vector<8x32xf32> to vector<8x32xbf16>
    %48 = vector.shape_cast %47 : vector<8x32xbf16> to vector<1x8x32xbf16>
    %49 = vector.shape_cast %48 : vector<1x8x32xbf16> to vector<1x8x32xbf16>
    %50 = vector.broadcast %49 : vector<1x8x32xbf16> to vector<4x8x32xbf16>
    %51 = arith.truncf %46 : vector<8x32xf32> to vector<8x32xbf16>
    %52 = vector.shape_cast %51 : vector<8x32xbf16> to vector<1x8x32xbf16>
    %53 = vector.shape_cast %52 : vector<1x8x32xbf16> to vector<1x8x32xbf16>
    %54 = vector.broadcast %53 : vector<1x8x32xbf16> to vector<4x8x32xbf16>
    %c0_18 = arith.constant 0 : index
    %c0_19 = arith.constant 0 : index
    %c0_20 = arith.constant 0 : index
    %55 = vector.load %arg5[%c0_18, %c0_19, %c0_20] : memref<4x32x8xbf16, #tpu.memory_space<vmem>>, vector<4x32x8xbf16>
    "tpu.trace_start"() <{level = 10 : i32, message = "hrc,hcd->hrd"}> : () -> ()
    %cst_21 = arith.constant dense<0.000000e+00> : vector<4x8x8xf32>
    %56 = tpu.matmul %50, %55, %cst_21 {dimension_numbers = #tpu.dot_dimension_numbers<[2], [1], [1], [2], [0, 0, 0, 1, 1, 2], [0], [0]>} : vector<4x8x32xbf16>, vector<4x32x8xbf16>, vector<4x8x8xf32> -> vector<4x8x8xf32>
    "tpu.trace_stop"() : () -> ()
    %c0_22 = arith.constant 0 : index
    %c0_23 = arith.constant 0 : index
    %c0_24 = arith.constant 0 : index
    %57 = vector.load %arg6[%c0_22, %c0_23, %c0_24] : memref<4x32x16xbf16, #tpu.memory_space<vmem>>, vector<4x32x16xbf16>
    "tpu.trace_start"() <{level = 10 : i32, message = "hrc,hcd->hrd"}> : () -> ()
    %cst_25 = arith.constant dense<0.000000e+00> : vector<4x8x16xf32>
    %58 = tpu.matmul %54, %57, %cst_25 {dimension_numbers = #tpu.dot_dimension_numbers<[2], [1], [1], [2], [0, 0, 0, 1, 1, 2], [0], [0]>} : vector<4x8x32xbf16>, vector<4x32x16xbf16>, vector<4x8x16xf32> -> vector<4x8x16xf32>
    "tpu.trace_stop"() : () -> ()
    %59 = vector.extract_strided_slice %58 {offsets = [0, 0, 0], sizes = [4, 8, 8], strides = [1, 1, 1]} : vector<4x8x16xf32> to vector<4x8x8xf32>
    %60 = vector.extract_strided_slice %58 {offsets = [0, 0, 8], sizes = [4, 8, 8], strides = [1, 1, 1]} : vector<4x8x16xf32> to vector<4x8x8xf32>
    %cst_26 = arith.constant 0.353553385 : f32
    %61 = vector.broadcast %cst_26 : f32 to vector<4x8x8xf32>
    %62 = arith.mulf %56, %61 : vector<4x8x8xf32>
    %63 = arith.truncf %62 : vector<4x8x8xf32> to vector<4x8x8xbf16>
    %64 = arith.truncf %59 : vector<4x8x8xf32> to vector<4x8x8xbf16>
    "tpu.trace_start"() <{level = 10 : i32, message = "hqd,hkd->hqk"}> : () -> ()
    %cst_27 = arith.constant dense<0.000000e+00> : vector<4x8x8xf32>
    %65 = tpu.matmul %63, %64, %cst_27 {dimension_numbers = #tpu.dot_dimension_numbers<[2], [2], [1], [1], [0, 0, 0, 1, 1, 1], [0], [0]>} : vector<4x8x8xbf16>, vector<4x8x8xbf16>, vector<4x8x8xf32> -> vector<4x8x8xf32>
    "tpu.trace_stop"() : () -> ()
    %66 = tpu.iota {dimensions = array<i32: 0>} : vector<8x8xi32>
    %67 = vector.broadcast %4 : i32 to vector<8x8xi32>
    %68 = arith.addi %67, %66 : vector<8x8xi32>
    %69 = tpu.iota {dimensions = array<i32: 1>} : vector<8x8xi32>
    %70 = arith.cmpi sle, %69, %68 : vector<8x8xi32>
    %71 = vector.shape_cast %70 : vector<8x8xi1> to vector<1x8x8xi1>
    %cst_28 = arith.constant 0xFF800000 : f32
    %72 = vector.shape_cast %71 : vector<1x8x8xi1> to vector<1x8x8xi1>
    %73 = vector.broadcast %72 : vector<1x8x8xi1> to vector<4x8x8xi1>
    %74 = vector.broadcast %cst_28 : f32 to vector<4x8x8xf32>
    %75 = arith.select %73, %65, %74 : vector<4x8x8xi1>, vector<4x8x8xf32>
    %cst_29 = arith.constant dense<0xFF800000> : vector<4x8xf32>
    %76 = vector.multi_reduction <maximumf>, %75, %cst_29 [2] : vector<4x8x8xf32> to vector<4x8xf32>
    %77 = vector.shape_cast %76 : vector<4x8xf32> to vector<4x8x1xf32>
    %78 = vector.broadcast %77 : vector<4x8x1xf32> to vector<4x8x8xf32>
    %79 = arith.subf %75, %78 : vector<4x8x8xf32>
    %80 = math.exp %79 : vector<4x8x8xf32>
    %cst_30 = arith.constant dense<0.000000e+00> : vector<4x8xf32>
    %81 = vector.multi_reduction <add>, %80, %cst_30 [2] : vector<4x8x8xf32> to vector<4x8xf32>
    %82 = vector.shape_cast %81 : vector<4x8xf32> to vector<4x8x1xf32>
    %83 = tpu.reciprocal %82 {approx = true} : vector<4x8x1xf32> -> vector<4x8x1xf32>
    %84 = vector.broadcast %83 : vector<4x8x1xf32> to vector<4x8x8xf32>
    %85 = arith.mulf %80, %84 : vector<4x8x8xf32>
    %86 = arith.truncf %85 : vector<4x8x8xf32> to vector<4x8x8xbf16>
    %87 = arith.truncf %60 : vector<4x8x8xf32> to vector<4x8x8xbf16>
    "tpu.trace_start"() <{level = 10 : i32, message = "hqk,hkd->hqd"}> : () -> ()
    %cst_31 = arith.constant dense<0.000000e+00> : vector<4x8x8xf32>
    %88 = tpu.matmul %86, %87, %cst_31 {dimension_numbers = #tpu.dot_dimension_numbers<[2], [1], [1], [2], [0, 0, 0, 1, 1, 2], [0], [0]>} : vector<4x8x8xbf16>, vector<4x8x8xbf16>, vector<4x8x8xf32> -> vector<4x8x8xf32>
    "tpu.trace_stop"() : () -> ()
    %89 = arith.truncf %88 : vector<4x8x8xf32> to vector<4x8x8xbf16>
    %c0_32 = arith.constant 0 : index
    %c0_33 = arith.constant 0 : index
    %c0_34 = arith.constant 0 : index
    %90 = vector.load %arg7[%c0_32, %c0_33, %c0_34] : memref<4x8x32xbf16, #tpu.memory_space<vmem>>, vector<4x8x32xbf16>
    "tpu.trace_start"() <{level = 10 : i32, message = "hqd,hdc->hqc"}> : () -> ()
    %cst_35 = arith.constant dense<0.000000e+00> : vector<4x8x32xf32>
    %91 = tpu.matmul %89, %90, %cst_35 {dimension_numbers = #tpu.dot_dimension_numbers<[2], [1], [1], [2], [0, 0, 0, 1, 1, 2], [0], [0]>} : vector<4x8x8xbf16>, vector<4x8x32xbf16>, vector<4x8x32xf32> -> vector<4x8x32xf32>
    "tpu.trace_stop"() : () -> ()
    %92 = vector.extract_strided_slice %91 {offsets = [0, 0, 0], sizes = [1, 8, 32], strides = [1, 1, 1]} : vector<4x8x32xf32> to vector<1x8x32xf32>
    %93 = vector.shape_cast %92 : vector<1x8x32xf32> to vector<8x32xf32>
    %94 = vector.extract_strided_slice %91 {offsets = [1, 0, 0], sizes = [1, 8, 32], strides = [1, 1, 1]} : vector<4x8x32xf32> to vector<1x8x32xf32>
    %95 = vector.shape_cast %94 : vector<1x8x32xf32> to vector<8x32xf32>
    %96 = arith.addf %93, %95 : vector<8x32xf32>
    %97 = vector.extract_strided_slice %91 {offsets = [2, 0, 0], sizes = [1, 8, 32], strides = [1, 1, 1]} : vector<4x8x32xf32> to vector<1x8x32xf32>
    %98 = vector.shape_cast %97 : vector<1x8x32xf32> to vector<8x32xf32>
    %99 = arith.addf %96, %98 : vector<8x32xf32>
    %100 = vector.extract_strided_slice %91 {offsets = [3, 0, 0], sizes = [1, 8, 32], strides = [1, 1, 1]} : vector<4x8x32xf32> to vector<1x8x32xf32>
    %101 = vector.shape_cast %100 : vector<1x8x32xf32> to vector<8x32xf32>
    %102 = arith.addf %99, %101 : vector<8x32xf32>
    %103 = arith.addf %1, %102 : vector<8x32xf32>
    %cst_36 = arith.constant dense<0.000000e+00> : vector<8xf32>
    %104 = vector.multi_reduction <add>, %103, %cst_36 [1] : vector<8x32xf32> to vector<8xf32>
    %105 = vector.shape_cast %104 : vector<8xf32> to vector<8x1xf32>
    %cst_37 = arith.constant 3.200000e+01 : f32
    %106 = vector.broadcast %cst_37 : f32 to vector<8x1xf32>
    %107 = arith.divf %105, %106 : vector<8x1xf32>
    %108 = vector.broadcast %107 : vector<8x1xf32> to vector<8x32xf32>
    %109 = arith.subf %103, %108 : vector<8x32xf32>
    %110 = arith.mulf %109, %109 : vector<8x32xf32>
    %cst_38 = arith.constant dense<0.000000e+00> : vector<8xf32>
    %111 = vector.multi_reduction <add>, %110, %cst_38 [1] : vector<8x32xf32> to vector<8xf32>
    %112 = vector.shape_cast %111 : vector<8xf32> to vector<8x1xf32>
    %cst_39 = arith.constant 3.200000e+01 : f32
    %113 = vector.broadcast %cst_39 : f32 to vector<8x1xf32>
    %114 = arith.divf %112, %113 : vector<8x1xf32>
    %115 = vector.broadcast %107 : vector<8x1xf32> to vector<8x32xf32>
    %116 = arith.subf %103, %115 : vector<8x32xf32>
    %cst_40 = arith.constant 9.99999974E-6 : f32
    %117 = vector.broadcast %cst_40 : f32 to vector<8x1xf32>
    %118 = arith.addf %114, %117 : vector<8x1xf32>
    %119 = math.rsqrt %118 : vector<8x1xf32>
    %120 = vector.broadcast %119 : vector<8x1xf32> to vector<8x32xf32>
    %121 = arith.mulf %116, %120 : vector<8x32xf32>
    %122 = vector.broadcast %6 : vector<1x32xf32> to vector<8x32xf32>
    %123 = arith.mulf %121, %122 : vector<8x32xf32>
    %124 = arith.truncf %123 : vector<8x32xf32> to vector<8x32xbf16>
    %c0_41 = arith.constant 0 : index
    %c0_42 = arith.constant 0 : index
    %125 = vector.load %arg9[%c0_41, %c0_42] : memref<32x128xbf16, #tpu.memory_space<vmem>>, vector<32x128xbf16>
    %cst_43 = arith.constant dense<0.000000e+00> : vector<8x128xf32>
    %126 = tpu.matmul %124, %125, %cst_43 {dimension_numbers = #tpu.dot_dimension_numbers<[1], [0], [0], [1], [0, 0, 1, 1], [], []>} : vector<8x32xbf16>, vector<32x128xbf16>, vector<8x128xf32> -> vector<8x128xf32>
    %cst_44 = arith.constant 5.000000e-01 : f32
    %127 = vector.broadcast %cst_44 : f32 to vector<8x128xf32>
    %128 = arith.mulf %127, %126 : vector<8x128xf32>
    %cst_45 = arith.constant 0.707106769 : f32
    %129 = vector.broadcast %cst_45 : f32 to vector<8x128xf32>
    %130 = arith.mulf %126, %129 : vector<8x128xf32>
    %131 = math.erf %130 : vector<8x128xf32>
    %cst_46 = arith.constant 1.000000e+00 : f32
    %132 = vector.broadcast %cst_46 : f32 to vector<8x128xf32>
    %133 = arith.addf %132, %131 : vector<8x128xf32>
    %134 = arith.mulf %128, %133 : vector<8x128xf32>
    %135 = arith.truncf %134 : vector<8x128xf32> to vector<8x128xbf16>
    %c0_47 = arith.constant 0 : index
    %c0_48 = arith.constant 0 : index
    %136 = vector.load %arg10[%c0_47, %c0_48] : memref<128x32xbf16, #tpu.memory_space<vmem>>, vector<128x32xbf16>
    %cst_49 = arith.constant dense<0.000000e+00> : vector<8x32xf32>
    %137 = tpu.matmul %135, %136, %cst_49 {dimension_numbers = #tpu.dot_dimension_numbers<[1], [0], [0], [1], [0, 0, 1, 1], [], []>} : vector<8x128xbf16>, vector<128x32xbf16>, vector<8x32xf32> -> vector<8x32xf32>
    %138 = arith.addf %103, %137 : vector<8x32xf32>
    %c0_50 = arith.constant 0 : index
    %c0_51 = arith.constant 0 : index
    %c0_52 = arith.constant 0 : index
    %139 = vector.load %arg11[%c0_50, %c0_51, %c0_52] : memref<1x8x32xf32, #tpu.memory_space<vmem>>, vector<1x8x32xf32>
    %140 = vector.shape_cast %139 : vector<1x8x32xf32> to vector<8x32xf32>
    %141 = vector.shape_cast %138 : vector<8x32xf32> to vector<1x8x32xf32>
    tpu.vector_store %arg11[%c0_50, %c0_51, %c0_52], %141 {strides = array<i32>} : memref<1x8x32xf32, #tpu.memory_space<vmem>>, vector<1x8x32xf32>,
    return
  }
  func.func @transform_0(%arg0: i32, %arg1: i32) -> (i32, i32, i32) {
    %c0_i32 = arith.constant 0 : i32
    %c0_i32_0 = arith.constant 0 : i32
    return %arg0, %arg1, %c0_i32 : i32, i32, i32
  }
  func.func @transform_1(%arg0: i32, %arg1: i32) -> (i32, i32, i32) {
    %c0_i32 = arith.constant 0 : i32
    %c0_i32_0 = arith.constant 0 : i32
    %c0_i32_1 = arith.constant 0 : i32
    return %arg0, %c0_i32, %c0_i32_0 : i32, i32, i32
  }
  func.func @transform_2(%arg0: i32, %arg1: i32) -> (i32, i32) {
    %c0_i32 = arith.constant 0 : i32
    %c0_i32_0 = arith.constant 0 : i32
    %c0_i32_1 = arith.constant 0 : i32
    return %c0_i32, %c0_i32_0 : i32, i32
  }
  func.func @transform_3(%arg0: i32, %arg1: i32) -> (i32, i32, i32) {
    %c0_i32 = arith.constant 0 : i32
    %c0_i32_0 = arith.constant 0 : i32
    %c0_i32_1 = arith.constant 0 : i32
    %c0_i32_2 = arith.constant 0 : i32
    return %c0_i32, %c0_i32_0, %c0_i32_1 : i32, i32, i32
  }
  func.func @transform_4(%arg0: i32, %arg1: i32) -> (i32, i32, i32) {
    %c0_i32 = arith.constant 0 : i32
    %c0_i32_0 = arith.constant 0 : i32
    %c0_i32_1 = arith.constant 0 : i32
    %c0_i32_2 = arith.constant 0 : i32
    return %c0_i32, %c0_i32_0, %c0_i32_1 : i32, i32, i32
  }
  func.func @transform_5(%arg0: i32, %arg1: i32) -> (i32, i32, i32) {
    %c0_i32 = arith.constant 0 : i32
    %c0_i32_0 = arith.constant 0 : i32
    %c0_i32_1 = arith.constant 0 : i32
    %c0_i32_2 = arith.constant 0 : i32
    return %c0_i32, %c0_i32_0, %c0_i32_1 : i32, i32, i32
  }
  func.func @transform_6(%arg0: i32, %arg1: i32) -> (i32, i32) {
    %c0_i32 = arith.constant 0 : i32
    %c0_i32_0 = arith.constant 0 : i32
    %c0_i32_1 = arith.constant 0 : i32
    return %c0_i32, %c0_i32_0 : i32, i32
  }
  func.func @transform_7(%arg0: i32, %arg1: i32) -> (i32, i32) {
    %c0_i32 = arith.constant 0 : i32
    %c0_i32_0 = arith.constant 0 : i32
    %c0_i32_1 = arith.constant 0 : i32
    return %c0_i32, %c0_i32_0 : i32, i32
  }
  func.func @transform_8(%arg0: i32, %arg1: i32) -> (i32, i32) {
    %c0_i32 = arith.constant 0 : i32
    %c0_i32_0 = arith.constant 0 : i32
    %c0_i32_1 = arith.constant 0 : i32
    return %c0_i32, %c0_i32_0 : i32, i32
  }
  func.func @transform_9(%arg0: i32, %arg1: i32) -> (i32, i32, i32) {
    %c0_i32 = arith.constant 0 : i32
    %c0_i32_0 = arith.constant 0 : i32
    return %arg0, %arg1, %c0_i32 : i32, i32, i32
  }
}

</mosaic_0001>

<bundles_post_ra>
// kernel: tpu_custom_call.1
= control target key start
LH: loop header
LB: loop body
LE: loop exit
PB: predicated region body
PF: predicated region fallthrough
CT: control target
= control target key end

     0   :  { %14 = vsyncpa [#allocation3], 0  ;;  %s2707_s0 = inlined_call_operand.vmem [shape: f32[2,8,32], index: 0, kind: input, shape index: {}]   ;;  %s2708_s1 = inlined_call_operand.vmem [shape: f32[2,8,32], index: 1, kind: input, shape index: {}]   ;;  %s2709_s2 = inlined_call_operand.vmem [shape: f32[1,32], index: 2, kind: input, shape index: {}]   ;;  %s2710_s3 = inlined_call_operand.vmem [shape: bf16[4,32,8], index: 3, kind: input, shape index: {}]   ;;  %s2711_s4 = inlined_call_operand.vmem [shape: bf16[4,32,16], index: 4, kind: input, shape index: {}]   ;;  %s2712_s5 = inlined_call_operand.vmem [shape: bf16[4,8,32], index: 5, kind: input, shape index: {}]   ;;  %s2713_s6 = inlined_call_operand.vmem [shape: f32[1,32], index: 6, kind: input, shape index: {}]   ;;  %s2714_s7 = inlined_call_operand.vmem [shape: bf16[32,128], index: 7, kind: input, shape index: {}]   ;;  %s2715_s8 = inlined_call_operand.vmem [shape: bf16[128,32], index: 8, kind: input, shape index: {}]   ;;  %s2716_s9 = inlined_call_operand.hbm [shape: f32[2,8,32], index: 9, kind: output, shape index: {}]  }
   0x1   :  { %16 = vsyncpa [#allocation3 + $0x1], 0  ;;  %s2336_s30 = smov 0   ;;  %s2338_s10 = smov 0  }
   0x2   :  { %s2340_s11 = smov 0   ;;  %s2342_s12 = smov 0  }
   0x3   :  { %s2344_s13 = smov 0   ;;  %s2346_s14 = smov 0  }
   0x4 LB: > { %s1809_s15 = sadd.s32 4294967295, %s2280_s14   ;;  %s1810_s16 = sadd.s32 4294967294, %s2280_s14   ;;  %s2280_s14 = sphi %s2346_s14, %s22_s14   ;;  %s2276_s13 = sphi %s2344_s13, %s2723_s13   ;;  %s2272_s12 = sphi %s2342_s12, %s2722_s12   ;;  %s2268_s11 = sphi %s2340_s11, %s2721_s11   ;;  %s2264_s10 = sphi %s2338_s10, %s2720_s10   ;;  %s2260_s30 = sphi %s2336_s30, %s2719_s30  }
   0x5   : > { %s34_s17 = sadd.s32 1, %s2276_s13  ;;  %s244_s18 = sadd.s32 1, %s2268_s11 }
   0x6   : > { %p36_p0 = scmp.ge.s32.totalorder %s34_s17, 2  ;;  %p254_p1 = scmp.ne.s32.totalorder %s2268_s11, %s2264_s10 }
   0x7   : > { %p255_p2 = scmp.eq.s32.totalorder %s1809_s15, 1  ;;  %p260_p3 = scmp.ne.s32.totalorder %s2264_s10, %s2260_s30 }
   0x8   : > { %s2725_s17 = smov (%p36_p0, %s34_s17), 0  ;;  %p261_p5 = scmp.eq.s32.totalorder %s1810_s16, 1 }
   0x9   : > { %p2376_p4 = por %p255_p2, %p254_p1  ;;  %s239_s20 = ssub.s32 %s2276_s13, %s2725_s17 }
   0xa   : > { %p1813_p6 = scmp.ge.s32.totalorder %s2280_s14, 1  ;;  %p242_p7 = scmp.eq.s32.totalorder %s239_s20, 0 }
   0xb   : > { %p2383_p8 = por %p261_p5, %p260_p3  ;;  %p317_p9 = scmp.lt.s32.totalorder %s2280_s14, 3 }
   0xc   : > { %s2389_s22 = scalar_select %p242_p7, %s2268_s11, %s244_s18  }
   0xd   : > { %p318_p10 = pnand %p1813_p6, %p317_p9 }
   0xe   : > { %p359_p11 = scmp.lt.s32.totalorder (!%p318_p10), %s2272_s12, 1  ;;  %vm376_vm0 = vcmask (!%p318_p10), 261120   ;;  %v2152_v14 = vld [vmem:[%s2710_s3] sm:$0xff] (!%p318_p10)   ;;  %v2153_v15 = vld [vmem:[%s2710_s3 + $0x30] sm:$0xff] (!%p318_p10)   ;;  %v2282_v16 = vmov (!%p318_p10), 0.0   ;;  %v2154_v17 = vld [vmem:[%s2710_s3 + $0x8] sm:$0xff] (!%p318_p10)  }
   0xf   : > { %321 = sbr.rel (%p318_p10) target bundleno = 2328 (0x918), region = 56  ;;  %1930 = vmatprep.subr.bf16.mxu0 (!%p318_p10), %v2282_v16  ;;  %1954 = vmatprep.subr.bf16.mxu1 (!%p318_p10), %v2282_v16  ;;  %v2155_v18 = vld [vmem:[%s2710_s3 + $0x38] sm:$0xff] (!%p318_p10)   ;;  %vm2283_vm1 = vmmov (!%p318_p10), 0   ;;  %v1817_v26 = vld [vmem:[%s2709_s2] ss:$0 sm:$0xff] (!%p318_p10)  ;;  %v2156_v30 = vld [vmem:[%s2710_s3 + $0x10] sm:$0xff] (!%p318_p10)  }
  0x10   : > { %1931 = vmatpush3.bf16.msra.mxu0 (!%p318_p10), %v2152_v14  ;;  %1955 = vmatpush3.bf16.msra.mxu1 (!%p318_p10), %v2153_v15  ;;  %v2157_v31 = vld [vmem:[%s2711_s4 + $0x10] sm:$0xff] (!%p318_p10)   ;;  %v2158_v34 = vld [vmem:[%s2710_s3 + $0x18] sm:$0xff] (!%p318_p10)   ;;  %v2160_v37 = vld [vmem:[%s2710_s3 + $0x20] sm:$0xff] (!%p318_p10)   ;;  %vm880_vm2 = vcmask (!%p318_p10), 64512   ;;  %s2284_s18 = smov (!%p318_p10), 120   ;;  %vm1132_vm4 = vcmask (!%p318_p10), 1043456  }
  0x11   : > { %1932 = vmatprep.subr.bf16.mxu0 (!%p318_p10), %v2282_v16  ;;  %1956 = vmatprep.subr.bf16.mxu1 (!%p318_p10), %v2282_v16  ;;  %v2159_v35 = vld [vmem:[%s2711_s4 + $0x18] sm:$0xff] (!%p318_p10)   ;;  %v2161_v38 = vld [vmem:[%s2711_s4 + $0x30] sm:$0xff] (!%p318_p10)   ;;  %v2162_v40 = vld [vmem:[%s2710_s3 + $0x28] sm:$0xff] (!%p318_p10)   ;;  %s2285_s28 = smov (!%p318_p10), [#allocation2]  }
  0x12   : > { %1934 = vmatprep.mubr.msk.bf16.mxu0 (!%p318_p10), %vm2283_vm1, %v2282_v16  ;;  %1958 = vmatprep.mubr.msk.bf16.mxu1 (!%p318_p10), %vm2283_vm1, %v2282_v16  ;;  %v2163_v41 = vld [vmem:[%s2711_s4 + $0x38] sm:$0xff] (!%p318_p10)   ;;  %v2164_v42 = vld [vmem:[%s2711_s4] sm:$0xff] (!%p318_p10)   ;;  %v2165_v43 = vld [vmem:[%s2711_s4 + $0x8] sm:$0xff] (!%p318_p10)   ;;  %s2206_s29 = sshll.u32 (!%p318_p10), %s2285_s28, 4  ;;  %s2207_s29 = int_to_ptr.vmem [resolvable:$false] %s2206_s29 }
  0x13   : > { %v2166_v44 = vld [vmem:[%s2711_s4 + $0x20] sm:$0xff] (!%p318_p10)   ;;  %v2167_v45 = vld [vmem:[%s2711_s4 + $0x28] sm:$0xff] (!%p318_p10)  }
  0x14   : > { %1933 = vmatpush3.bf16.msra.mxu0 (!%p318_p10), %v2154_v17  ;;  %1957 = vmatpush3.bf16.msra.mxu1 (!%p318_p10), %v2155_v18 }
  0x15   : > { %1938 = vmatprep.subr.bf16.mxu0 (!%p318_p10), %v2282_v16  ;;  %1970 = vmatprep.subr.bf16.mxu1 (!%p318_p10), %v2282_v16 }
  0x16   : > { %s360_s23 = scalar_select %p359_p11, %s2272_s12, 1 }
  0x18   : > { %s1815_s24 = sshll.u32 %s360_s23, 3 }
  0x19   : > { %s365_s27 = scalar_lea.vmem %s2707_s0, %s1815_s24  ;;  %s369_s15 = scalar_lea.vmem %s2708_s1, %s1815_s24 }
  0x1a   : > { %v2399_v0 = vld [vmem:[%s365_s27] sm:$0xff] }
  0x1b   : > { %v372_v1 = vld [vmem:[%s369_s15] sm:$0xff]  ;;  %v377_v2 = vsel %vm376_vm0, %v2399_v0, 0.0  ;;  %s356_s15 = sand.u32 1, %s2264_s10  }
  0x1c   : > { %v398_v3 = vsel %vm376_vm0, %v372_v1, 0.0  ;;  %378 = vadd.xlane.f32.xlu0 %v377_v2  ;;  %s1814_s16 = sshll.u32 %s356_s15, 3 }
  0x1d   : > { %s358_s20 = scalar_lea.vmem [#allocation2], %s1814_s16  ;;  %s2208_s16 = scalar_lea.vmem %s2207_s29, 256 }
  0x1e   : > { %s1726_s23 = sshll.u32 %s358_s20, 4  ;;  %s2661_s23 = int_to_ptr.vmem [resolvable:$true] %s1726_s23 }
  0x1f   : > { %s2202_s27 = scalar_lea.vmem %s2661_s23, 128  ;;  %p2209_p1 = scmp.lt.s32.totalorder %s2661_s23, %s2207_s29 }
  0x20   : > { %399 = vadd.xlane.f32.xlu0 %v398_v3  ;;  %p2203_p12 = scmp.ne.s32.totalorder %s2661_s23, %s2202_s27  ;;  %p2210_p2 = scmp.lt.s32.totalorder %s2208_s16, %s2202_s27 }
  0x22   : > { %p2204_p13 = pnand %p2203_p12, %p2376_p4  ;;  %p2211_p3 = por %p2210_p2, %p2209_p1 }
  0x24   : > { %p2205_p0 = pneg %p2204_p13 }
  0x26   : > { %p2212_p5 = pnand %p2211_p3, %p2205_p0 }
  0xa9   : > { %v379_v4 = vpop.xlane.xlu0 %378 }
  0xaa   : > { %v381_v5 = vmul.f32 0.03125, %v379_v4 }
  0xac   : > { %v382_v6 = vsub.f32 %v2399_v0, %v381_v5 }
  0xad   : > { %v400_v7 = vpop.xlane.xlu0 %399 }
  0xae   : > { %v401_v8 = vmul.f32 0.03125, %v400_v7  ;;  %v383_v9 = vmul.f32 %v382_v6, %v382_v6 }
  0xb0   : > { %v402_v10 = vsub.f32 %v372_v1, %v401_v8  ;;  %v384_v11 = vsel %vm376_vm0, %v383_v9, 0.0 }
  0xb1   : > { %385 = vadd.xlane.f32.xlu1 %v384_v11 }
  0xb2   : > { %v403_v12 = vmul.f32 %v402_v10, %v402_v10 }
  0xb4   : > { %v404_v13 = vsel %vm376_vm0, %v403_v12, 0.0 }
  0xb5   : > { %405 = vadd.xlane.f32.xlu1 %v404_v13 }
 0x13e   : > { %v386_v19 = vpop.xlane.xlu1 %385 }
 0x13f   : > { %v387_v20 = vmul.f32 0.03125, %v386_v19 }
 0x141   : > { %v388_v21 = vadd.f32 1e-05, %v387_v20 }
 0x142   : > { %v406_v22 = vpop.xlane.xlu1 %405 }
 0x143   : > { %2178 = vrsqrt.f32 %v388_v21  ;;  %v407_v23 = vmul.f32 0.03125, %v406_v22 }
 0x145   : > { %v408_v24 = vadd.f32 1e-05, %v407_v23 }
 0x147   : > { %2180 = vrsqrt.f32 %v408_v24 }
 0x14d   : > { %v2179_v25 = vpop.eup %2178 }
 0x14e   : > { %v390_v27 = vmul.f32 %v2179_v25, %v382_v6 }
 0x150   : > { %v397_v28 = vmul.f32 %v1817_v26, %v390_v27 }
 0x151   : > { %v2181_v29 = vpop.eup %2180 }
 0x152   : > { %v410_v32 = vmul.f32 %v2181_v29, %v402_v10  ;;  %v412_v33 = vpack.c.bf16 %v397_v28, %v397_v28 }
 0x154   : > { %1935 = vmatmul.mubr.msk.bf16.vlgmr.msra.gmra.mrb[0].mxu0 %vm376_vm0, %v412_v33  ;;  %1959 = vmatmul.mubr.msk.bf16.vlgmr.msra.gmra.mrb[0].mxu1 %vm376_vm0, %v412_v33  ;;  %v411_v36 = vmul.f32 %v1817_v26, %v410_v32  ;;  %v1065_v32 = vlaneseq }
 0x155   : > { %1939 = vmatpush3.bf16.msra.mxu0 %v2156_v30  ;;  %1971 = vmatpush3.bf16.msra.mxu1 %v2157_v31 }
 0x156   : > { %1940 = vmatprep.subr.bf16.mxu0 %v2282_v16  ;;  %1972 = vmatprep.subr.bf16.mxu1 %v2282_v16  ;;  %v413_v39 = vpack.c.bf16 %v411_v36, %v411_v36 }
 0x157   : > { %1942 = vmatprep.mubr.msk.bf16.mxu0 %vm2283_vm1, %v2282_v16  ;;  %1974 = vmatprep.mubr.msk.bf16.mxu1 %vm2283_vm1, %v2282_v16 }
 0x159   : > { %1941 = vmatpush3.bf16.msra.mxu0 %v2158_v34  ;;  %1973 = vmatpush3.bf16.msra.mxu1 %v2159_v35  ;;  %v1070_v34 = vand.u32 127, %v1065_v32 }
 0x15a   : > { %1946 = vmatprep.subr.bf16.mxu0 %v2282_v16  ;;  %1986 = vmatprep.subr.bf16.mxu1 %v2282_v16 }
 0x15c   : > { %1943 = vmatmul.mubr.msk.bf16.vlgmr.msra.gmra.mrb[4].mxu0 %vm376_vm0, %v412_v33  ;;  %1975 = vmatmul.mubr.msk.bf16.vlgmr.msra.gmra.mrb[4].mxu1 %vm376_vm0, %v413_v39 }
 0x15d   : > { %1947 = vmatpush3.bf16.msra.mxu0 %v2160_v37  ;;  %1987 = vmatpush3.bf16.msra.mxu1 %v2161_v38 }
 0x15e   : > { %1948 = vmatprep.subr.bf16.mxu0 %v2282_v16  ;;  %1988 = vmatprep.subr.bf16.mxu1 %v2282_v16 }
 0x15f   : > { %1950 = vmatprep.mubr.msk.bf16.mxu0 %vm2283_vm1, %v2282_v16  ;;  %1990 = vmatprep.mubr.msk.bf16.mxu1 %vm2283_vm1, %v2282_v16 }
 0x161   : > { %1949 = vmatpush3.bf16.msra.mxu0 %v2162_v40  ;;  %1989 = vmatpush3.bf16.msra.mxu1 %v2163_v41 }
 0x162   : > { %1962 = vmatprep.subr.bf16.mxu0 %v2282_v16  ;;  %2000 = vmatprep.subr.bf16.mxu1 %v2282_v16 }
 0x164   : > { %1951 = vmatmul.mubr.msk.bf16.vlgmr.msra.gmra.mrb[8].mxu0 %vm376_vm0, %v412_v33  ;;  %1991 = vmatmul.mubr.msk.bf16.vlgmr.msra.gmra.mrb[8].mxu1 %vm376_vm0, %v413_v39  ;;  %v1066_v33 = vshrl.u32 %v1065_v32, 7 }
 0x165   : > { %1963 = vmatpush3.bf16.msra.mxu0 %v2164_v42  ;;  %1966 = vmatprep.mubr.msk.bf16.mxu0 %vm2283_vm1, %v2282_v16 }
 0x166   : > { %1964 = vmatprep.subr.bf16.mxu0 %v2282_v16  ;;  %2002 = vmatprep.mubr.msk.bf16.mxu1 %vm2283_vm1, %v2282_v16  ;;  %vm1071_vm3 = vcmp.le.s32.totalorder %v1070_v34, %v1066_v33 }
 0x169   : > { %1965 = vmatpush3.bf16.msra.mxu0 %v2165_v43 }
 0x16a   : > { %1978 = vmatprep.subr.bf16.mxu0 %v2282_v16 }
 0x16c   : > { %1967 = vmatmul.mubr.msk.bf16.vlgmr.msra.gmra.mrb[12].mxu0 %vm376_vm0, %v413_v39 }
 0x16d   : > { %1979 = vmatpush3.bf16.msra.mxu0 %v2166_v44  ;;  %1982 = vmatprep.mubr.msk.bf16.mxu0 %vm2283_vm1, %v2282_v16 }
 0x16e   : > { %1980 = vmatprep.subr.bf16.mxu0 %v2282_v16 }
 0x171   : > { %1981 = vmatpush3.bf16.msra.mxu0 %v2167_v45 }
 0x172   : > { %1994 = vmatprep.subr.bf16.mxu0 %v2282_v16 }
 0x174   : > { %1983 = vmatmul.mubr.msk.bf16.vlgmr.msra.gmra.mrb[16].mxu0 %vm376_vm0, %v413_v39 }
 0x175   : > { %1996 = vmatprep.mubr.msk.bf16.mxu0 %vm2283_vm1, %v2282_v16 }
 0x227   : > { %v479_v46 = vpop.f32.mrb[0].mxu0  ;;  %v635_v47 = vpop.f32.mrb[0].mxu1 }
 0x228   : > { %v1936_v48 = vpop.f32.mrb[1].mxu0  ;;  %v1960_v49 = vpop.f32.mrb[1].mxu1  ;;  %v871_v13 = vmul.f32 0.35355338, %v635_v47  ;;  %v868_v22 = vmul.f32 0.35355338, %v479_v46 }
 0x229   : > { %v482_v50 = vpop.f32.mrb[2].mxu0  ;;  %v638_v51 = vpop.f32.mrb[2].mxu1 }
 0x22a   : > { %v1937_v52 = vpop.f32.mrb[3].mxu0  ;;  %v1961_v53 = vpop.f32.mrb[3].mxu1  ;;  %v875_v15 = vpack.c.bf16 %v871_v13, %v871_v13  ;;  %v872_v24 = vpack.c.bf16 %v868_v22, %v868_v22 }
 0x22f   : > { %v531_v54 = vpop.f32.mrb[4].mxu0  ;;  %v758_v55 = vpop.f32.mrb[4].mxu1 }
 0x230   : > { %v2504_v56 = vpack.c.bf16 %v758_v55, %v758_v55  ;;  %v1944_v57 = vpop.f32.mrb[5].mxu0  ;;  %v1976_v58 = vpop.f32.mrb[5].mxu1  ;;  %v869_v1 = vmul.f32 0.35355338, %v531_v54 }
 0x231   : > { %v534_v59 = vpop.f32.mrb[6].mxu0  ;;  %v761_v60 = vpop.f32.mrb[6].mxu1 }
 0x232   : > { %v931_v61 = vsel %vm880_vm2, %v2504_v56, 0  ;;  %v1945_v62 = vpop.f32.mrb[7].mxu0  ;;  %v1977_v63 = vpop.f32.mrb[7].mxu1  ;;  %v873_v4 = vpack.c.bf16 %v869_v1, %v869_v1 }
 0x233   : > { %2001 = vmatpush3.bf16.xpose.msra.mxu1 %v931_v61 }
 0x234   : > { %2012 = vmatprep.subr.bf16.mxu1 %v2282_v16 }
 0x237   : > { %v583_v2 = vpop.f32.mrb[8].mxu0  ;;  %v862_v3 = vpop.f32.mrb[8].mxu1 }
 0x238   : > { %v2509_v5 = vpack.c.bf16 %v862_v3, %v862_v3  ;;  %v1952_v6 = vpop.f32.mrb[9].mxu0  ;;  %v1992_v7 = vpop.f32.mrb[9].mxu1  ;;  %v870_v30 = vmul.f32 0.35355338, %v583_v2 }
 0x239   : > { %v586_v8 = vpop.f32.mrb[10].mxu0  ;;  %v865_v9 = vpop.f32.mrb[10].mxu1 }
 0x23a   : > { %v1023_v10 = vsel %vm880_vm2, %v2509_v5, 0  ;;  %v1953_v11 = vpop.f32.mrb[11].mxu0  ;;  %v1993_v12 = vpop.f32.mrb[11].mxu1  ;;  %2003 = vmatmul.mubr.msk.bf16.vlgmr.msra.gmra.mrb[12].mxu1 %vm880_vm2, %v873_v4  ;;  %v874_v31 = vpack.c.bf16 %v870_v30, %v870_v30 }
 0x23b   : > { %2013 = vmatpush3.bf16.xpose.msra.mxu1 %v1023_v10  ;;  %2014 = vmatprep.mubr.msk.bf16.mxu1 %vm2283_vm1, %v2282_v16 }
 0x23c   : > { %2024 = vmatprep.subr.bf16.mxu1 %v2282_v16 }
 0x23f   : > { %v706_v14 = vpop.f32.mrb[12].mxu0 }
 0x240   : > { %v2517_v17 = vpack.c.bf16 %v706_v14, %v706_v14  ;;  %v1968_v18 = vpop.f32.mrb[13].mxu0 }
 0x241   : > { %v709_v19 = vpop.f32.mrb[14].mxu0 }
 0x242   : > { %v885_v20 = vsel %vm880_vm2, %v2517_v17, 0  ;;  %v1969_v21 = vpop.f32.mrb[15].mxu0  ;;  %2015 = vmatmul.mubr.msk.bf16.vlgmr.msra.gmra.mrb[16].mxu1 %vm880_vm2, %v875_v15 }
 0x243   : > { %1995 = vmatpush3.bf16.xpose.msra.mxu0 %v885_v20  ;;  %2026 = vmatprep.mubr.msk.bf16.mxu1 %vm2283_vm1, %v2282_v16 }
 0x244   : > { %2006 = vmatprep.subr.bf16.mxu0 %v2282_v16 }
 0x247   : > { %v810_v23 = vpop.f32.mrb[16].mxu0 }
 0x248   : > { %v2525_v25 = vpack.c.bf16 %v810_v23, %v810_v23  ;;  %v1984_v26 = vpop.f32.mrb[17].mxu0 }
 0x249   : > { %v813_v27 = vpop.f32.mrb[18].mxu0 }
 0x24a   : > { %v977_v28 = vsel %vm880_vm2, %v2525_v25, 0  ;;  %v1985_v29 = vpop.f32.mrb[19].mxu0  ;;  %1997 = vmatmul.mubr.msk.bf16.vlgmr.msra.gmra.mrb[20].mxu0 %vm880_vm2, %v872_v24 }
 0x24b   : > { %2007 = vmatpush3.bf16.xpose.msra.mxu0 %v977_v28  ;;  %2008 = vmatprep.mubr.msk.bf16.mxu0 %vm2283_vm1, %v2282_v16 }
 0x24c   : > { %2018 = vmatprep.subr.bf16.mxu0 %v2282_v16 }
 0x252   : > { %2009 = vmatmul.mubr.msk.bf16.vlgmr.msra.gmra.mrb[24].mxu0 %vm880_vm2, %v874_v31 }
 0x253   : > { %2020 = vmatprep.mubr.msk.bf16.mxu0 %vm2283_vm1, %v2282_v16 }
 0x30d   : > { %v967_v35 = vpop.f32.mrb[12].mxu1 }
 0x30e   : > { %v1075_v36 = vsel %vm1071_vm3, %v967_v35, -inf  ;;  %v2004_v37 = vpop.f32.mrb[13].mxu1 }
 0x30f   : > { %v970_v38 = vpop.f32.mrb[14].mxu1  ;;  %v1081_v39 = vsel %vm880_vm2, %v1075_v36, -inf }
 0x310   : > { %1082 = vmax.xlane.f32.xlu1 %v1081_v39  ;;  %v2005_v40 = vpop.f32.mrb[15].mxu1 }
 0x315   : > { %v1059_v41 = vpop.f32.mrb[16].mxu1 }
 0x316   : > { %v1077_v42 = vsel %vm1071_vm3, %v1059_v41, -inf  ;;  %v2016_v43 = vpop.f32.mrb[17].mxu1  ;;  %v1328_v41 = vld [vmem:[%s2712_s5 + $0x4] sm:$0xf] }
 0x317   : > { %v1062_v44 = vpop.f32.mrb[18].mxu1  ;;  %v1087_v45 = vsel %vm880_vm2, %v1077_v42, -inf  ;;  %v1327_v43 = vld [vmem:[%s2712_s5] sm:$0xf] }
 0x318   : > { %1088 = vmax.xlane.f32.xlu1 %v1087_v45  ;;  %v2017_v46 = vpop.f32.mrb[19].mxu1  ;;  %v1335_v44 = vsel %vm1132_vm4, %v1327_v43, 0  ;;  %v1330_v45 = vld [vmem:[%s2712_s5 + $0xc] sm:$0xf] }
 0x31d   : > { %v921_v47 = vpop.f32.mrb[20].mxu0 }
 0x31e   : > { %v1074_v48 = vsel %vm1071_vm3, %v921_v47, -inf  ;;  %v1998_v49 = vpop.f32.mrb[21].mxu0 }
 0x31f   : > { %v924_v50 = vpop.f32.mrb[22].mxu0  ;;  %v1078_v51 = vsel %vm880_vm2, %v1074_v48, -inf  ;;  %v1473_v49 = vsel %vm1132_vm4, %v1330_v45, 0  ;;  %v2173_v45 = vld [vmem:[%s2715_s8 + $0x18] sm:$0xff]  }
 0x320   : > { %1079 = vmax.xlane.f32.xlu0 %v1078_v51  ;;  %v1999_v52 = vpop.f32.mrb[23].mxu0 }
 0x325   : > { %v1013_v53 = vpop.f32.mrb[24].mxu0 }
 0x326   : > { %v1076_v54 = vsel %vm1071_vm3, %v1013_v53, -inf  ;;  %v2010_v55 = vpop.f32.mrb[25].mxu0 }
 0x327   : > { %v1016_v57 = vpop.f32.mrb[26].mxu0  ;;  %v1084_v58 = vsel %vm880_vm2, %v1076_v54, -inf }
 0x328   : > { %1085 = vmax.xlane.f32.xlu0 %v1084_v58  ;;  %v2011_v59 = vpop.f32.mrb[27].mxu0  ;;  %v1329_v58 = vld [vmem:[%s2712_s5 + $0x8] sm:$0xf] }
 0x39d   : > { %v1083_v60 = vpop.xlane.xlu1 %1082 }
 0x39e   : > { %v1091_v61 = vsub.f32 %v1075_v36, %v1083_v60 }
 0x3a0   : > { %v1096_v62 = vmul.f32 1.442695, %v1091_v61 }
 0x3a2   : > { %2182 = vpow2.f32 %v1096_v62  ;;  %v1427_v62 = vsel %vm1132_vm4, %v1329_v58, 0 }
 0x3a5   : > { %v1089_v63 = vpop.xlane.xlu1 %1088 }
 0x3a6   : > { %v1093_v1 = vsub.f32 %v1077_v42, %v1089_v63  ;;  %v1381_v42 = vsel %vm1132_vm4, %v1328_v41, 0  ;;  %v1854_v41 = vld [vmem:[%s2713_s6] ss:$0 sm:$0xff] }
 0x3a8   : > { %v1100_v2 = vmul.f32 1.442695, %v1093_v1 }
 0x3aa   : > { %2184 = vpow2.f32 %v1100_v2 }
 0x3ac   : > { %v2183_v3 = vpop.eup %2182 }
 0x3ad   : > { %v1080_v4 = vpop.xlane.xlu0 %1079  ;;  %v1105_v6 = vsel %vm880_vm2, %v2183_v3, 0.0 }
 0x3ae   : > { %v1090_v7 = vsub.f32 %v1074_v48, %v1080_v4  ;;  %1106 = vadd.xlane.f32.xlu1 %v1105_v6 }
 0x3b0   : > { %v1094_v8 = vmul.f32 1.442695, %v1090_v7 }
 0x3b2   : > { %2186 = vpow2.f32 %v1094_v8 }
 0x3b4   : > { %v2185_v9 = vpop.eup %2184 }
 0x3b5   : > { %v1086_v10 = vpop.xlane.xlu0 %1085  ;;  %v1111_v11 = vsel %vm880_vm2, %v2185_v9, 0.0 }
 0x3b6   : > { %v1092_v12 = vsub.f32 %v1076_v54, %v1086_v10  ;;  %1112 = vadd.xlane.f32.xlu1 %v1111_v11 }
 0x3b8   : > { %v1098_v13 = vmul.f32 1.442695, %v1092_v12 }
 0x3ba   : > { %2188 = vpow2.f32 %v1098_v13 }
 0x3bc   : > { %v2187_v14 = vpop.eup %2186 }
 0x3bd   : > { %v1102_v15 = vsel %vm880_vm2, %v2187_v14, 0.0 }
 0x3be   : > { %1103 = vadd.xlane.f32.xlu0 %v1102_v15 }
 0x3c4   : > { %v2189_v18 = vpop.eup %2188 }
 0x3c5   : > { %v1108_v19 = vsel %vm880_vm2, %v2189_v18, 0.0 }
 0x3c6   : > { %1109 = vadd.xlane.f32.xlu0 %v1108_v19 }
 0x3c7   : > { %1177 = vrot.lane.b32.xlu1 %v2504_v56, %s2284_s18 }
 0x3cb   : > { %1226 = vrot.lane.b32.xlu1 %v2525_v25, %s2284_s18 }
 0x3cf   : > { %1275 = vrot.lane.b32.xlu1 %v2509_v5, %s2284_s18 }
 0x3dc   : > { %1127 = vrot.lane.b32.xlu0 %v2517_v17, %s2284_s18  ;;  %s1867_s18 = sshll.u32 %s2272_s12, 7  ;;  %s1712_s12 = scalar_lea.sflag [#allocation3], %s356_s15 }
 0x3dd   : > { %s2659_s26 = scalar_lea.hbm %s2716_s9, %s1867_s18 }
 0x43b   : > { %v1107_v20 = vpop.xlane.xlu1 %1106 }
 0x43c   : > { %2190 = vrcp.f32 %v1107_v20 }
 0x443   : > { %v1113_v21 = vpop.xlane.xlu1 %1112 }
 0x444   : > { %2192 = vrcp.f32 %v1113_v21 }
 0x446   : > { %v2191_v22 = vpop.eup %2190 }
 0x447   : > { %v1119_v23 = vmul.f32 %v2191_v22, %v2183_v3  ;;  %v1178_v24 = vpop.permute.xlu1 %1177 }
 0x448   : > { %v1183_v26 = vsel %vm1132_vm4, %v1178_v24, 0 }
 0x449   : > { %2025 = vmatpush3.bf16.msra.mxu1 %v1183_v26  ;;  %v1123_v27 = vpack.c.bf16 %v1119_v23, %v1119_v23 }
 0x44a   : > { %2036 = vmatprep.subr.bf16.mxu1 %v2282_v16 }
 0x44b   : > { %v1227_v56 = vpop.permute.xlu1 %1226  ;;  %v1104_v25 = vpop.xlane.xlu0 %1103 }
 0x44c   : > { %2194 = vrcp.f32 %v1104_v25  ;;  %2027 = vmatmul.mubr.msk.bf16.vlgmr.msra.gmra.mrb[20].mxu1 %vm880_vm2, %v1123_v27  ;;  %v1232_v37 = vsel %vm1132_vm4, %v1227_v56, 0 }
 0x44d   : > { %2038 = vmatprep.mubr.msk.bf16.mxu1 %vm2283_vm1, %v2282_v16 }
 0x44e   : > { %v2193_v5 = vpop.eup %2192 }
 0x44f   : > { %v1121_v17 = vmul.f32 %v2193_v5, %v2185_v9  ;;  %v1276_v28 = vpop.permute.xlu1 %1275 }
 0x450   : > { %v1281_v29 = vsel %vm1132_vm4, %v1276_v28, 0 }
 0x451   : > { %2037 = vmatpush3.bf16.msra.mxu1 %v1281_v29  ;;  %v1125_v30 = vpack.c.bf16 %v1121_v17, %v1121_v17 }
 0x452   : > { %2048 = vmatprep.subr.bf16.mxu1 %v2282_v16 }
 0x453   : > { %v1110_v31 = vpop.xlane.xlu0 %1109 }
 0x454   : > { %2196 = vrcp.f32 %v1110_v31  ;;  %2039 = vmatmul.mubr.msk.bf16.vlgmr.msra.gmra.mrb[24].mxu1 %vm880_vm2, %v1125_v30 }
 0x455   : > { %2050 = vmatprep.mubr.msk.bf16.mxu1 %vm2283_vm1, %v2282_v16  ;;  %2049 = vmatpush3.bf16.msra.mxu1 %v1381_v42 }
 0x456   : > { %v2195_v32 = vpop.eup %2194  ;;  %2060 = vmatprep.subr.bf16.mxu1 %v2282_v16 }
 0x457   : > { %v1118_v33 = vmul.f32 %v2195_v32, %v2187_v14  ;;  %v1128_v34 = vpop.permute.xlu0 %1127 }
 0x458   : > { %v1134_v35 = vsel %vm1132_vm4, %v1128_v34, 0  ;;  %v2170_v34 = vld [vmem:[%s2715_s8] sm:$0xff]  }
 0x459   : > { %2019 = vmatpush3.bf16.msra.mxu0 %v1134_v35  ;;  %v1122_v36 = vpack.c.bf16 %v1118_v33, %v1118_v33  ;;  %v2168_v33 = vld [vmem:[%s2714_s7] sm:$0xff]   ;;  %v2171_v35 = vld [vmem:[%s2715_s8 + $0x8] sm:$0xff]  }
 0x45a   : > { %2030 = vmatprep.subr.bf16.mxu0 %v2282_v16 }
 0x45c   : > { %2021 = vmatmul.mubr.msk.bf16.vlgmr.msra.gmra.mrb[28].mxu0 %vm880_vm2, %v1122_v36  ;;  %v2172_v36 = vld [vmem:[%s2715_s8 + $0x10] sm:$0xff]  }
 0x45d   : > { %2031 = vmatpush3.bf16.msra.mxu0 %v1232_v37  ;;  %2032 = vmatprep.mubr.msk.bf16.mxu0 %vm2283_vm1, %v2282_v16 }
 0x45e   : > { %v2197_v38 = vpop.eup %2196  ;;  %2042 = vmatprep.subr.bf16.mxu0 %v2282_v16 }
 0x45f   : > { %v1120_v39 = vmul.f32 %v2197_v38, %v2189_v18 }
 0x461   : > { %v1124_v40 = vpack.c.bf16 %v1120_v39, %v1120_v39 }
 0x464   : > { %2033 = vmatmul.mubr.msk.bf16.vlgmr.msra.gmra.mrb[32].mxu0 %vm880_vm2, %v1124_v40 }
 0x465   : > { %2044 = vmatprep.mubr.msk.bf16.mxu0 %vm2283_vm1, %v2282_v16  ;;  %2043 = vmatpush3.bf16.msra.mxu0 %v1335_v44 }
 0x466   : > { %2054 = vmatprep.subr.bf16.mxu0 %v2282_v16 }
 0x51f   : > { %v1219_v46 = vpop.f32.mrb[20].mxu1 }
 0x520   : > { %v1324_v47 = vpack.c.bf16 %v1219_v46, %v1219_v46  ;;  %v2028_v48 = vpop.f32.mrb[21].mxu1  ;;  %v2174_v46 = vld [vmem:[%s2715_s8 + $0x20] sm:$0xff]  }
 0x521   : > { %v1222_v50 = vpop.f32.mrb[22].mxu1  ;;  %v2176_v48 = vld [vmem:[%s2715_s8 + $0x30] sm:$0xff]  }
 0x522   : > { %v2029_v51 = vpop.f32.mrb[23].mxu1  ;;  %2051 = vmatmul.mubr.msk.bf16.vlgmr.msra.gmra.mrb[28].mxu1 %vm880_vm2, %v1324_v47  ;;  %v2175_v47 = vld [vmem:[%s2715_s8 + $0x28] sm:$0xff]  }
 0x523   : > { %2061 = vmatpush3.bf16.msra.mxu1 %v1473_v49  ;;  %2062 = vmatprep.mubr.msk.bf16.mxu1 %vm2283_vm1, %v2282_v16  ;;  %v2177_v49 = vld [vmem:[%s2715_s8 + $0x38] sm:$0xff]  }
 0x524   : > { %2074 = vmatprep.subr.bf16.mxu1 %v2282_v16 }
 0x527   : > { %v1317_v52 = vpop.f32.mrb[24].mxu1 }
 0x528   : > { %v1326_v53 = vpack.c.bf16 %v1317_v52, %v1317_v52  ;;  %v2040_v54 = vpop.f32.mrb[25].mxu1 }
 0x529   : > { %v1320_v55 = vpop.f32.mrb[26].mxu1 }
 0x52a   : > { %v2041_v57 = vpop.f32.mrb[27].mxu1  ;;  %2063 = vmatmul.mubr.msk.bf16.vlgmr.msra.gmra.mrb[32].mxu1 %vm880_vm2, %v1326_v53 }
 0x52b   : > { %2090 = vmatprep.mubr.msk.bf16.mxu1 %vm2283_vm1, %v2282_v16  ;;  %2075 = vmatpush3.bf16.msra.mxu1 %v2170_v34 }
 0x52c   : > { %2076 = vmatprep.subr.bf16.mxu1 %v2282_v16 }
 0x52f   : > { %v1170_v59 = vpop.f32.mrb[28].mxu0  ;;  %2077 = vmatpush3.bf16.msra.mxu1 %v2171_v35 }
 0x530   : > { %v1323_v60 = vpack.c.bf16 %v1170_v59, %v1170_v59  ;;  %v2022_v61 = vpop.f32.mrb[29].mxu0  ;;  %2078 = vmatprep.subr.bf16.mxu1 %v2282_v16 }
 0x531   : > { %v1173_v63 = vpop.f32.mrb[30].mxu0 }
 0x532   : > { %v2023_v1 = vpop.f32.mrb[31].mxu0  ;;  %2045 = vmatmul.mubr.msk.bf16.vlgmr.msra.gmra.mrb[36].mxu0 %vm880_vm2, %v1323_v60 }
 0x533   : > { %2055 = vmatpush3.bf16.msra.mxu0 %v1427_v62  ;;  %2056 = vmatprep.mubr.msk.bf16.mxu0 %vm2283_vm1, %v2282_v16 }
 0x534   : > { %2066 = vmatprep.subr.bf16.mxu0 %v2282_v16  ;;  %2079 = vmatpush3.bf16.msra.mxu1 %v2172_v36 }
 0x535   : > { %2080 = vmatprep.subr.bf16.mxu1 %v2282_v16 }
 0x537   : > { %v1268_v2 = vpop.f32.mrb[32].mxu0 }
 0x538   : > { %v1325_v3 = vpack.c.bf16 %v1268_v2, %v1268_v2  ;;  %v2034_v4 = vpop.f32.mrb[33].mxu0  ;;  %2081 = vmatpush3.bf16.msra.mxu1 %v2173_v45 }
 0x539   : > { %v1271_v6 = vpop.f32.mrb[34].mxu0  ;;  %2082 = vmatprep.subr.bf16.mxu1 %v2282_v16 }
 0x53a   : > { %v2035_v7 = vpop.f32.mrb[35].mxu0  ;;  %2057 = vmatmul.mubr.msk.bf16.vlgmr.msra.gmra.mrb[40].mxu0 %vm880_vm2, %v1325_v3 }
 0x53b   : > { %2070 = vmatprep.mubr.msk.bf16.mxu0 %vm2283_vm1, %v2282_v16  ;;  %2067 = vmatpush3.bf16.msra.mxu0 %v2168_v33 }
 0x53c   : > { %2068 = vmatprep.subr.bf16.mxu0 %v2282_v16  ;;  %2083 = vmatpush3.bf16.msra.mxu1 %v2174_v46 }
 0x53d   : > { %2084 = vmatprep.subr.bf16.mxu1 %v2282_v16 }
 0x540   : > { %2085 = vmatpush3.bf16.msra.mxu1 %v2175_v47 }
 0x541   : > { %2086 = vmatprep.subr.bf16.mxu1 %v2282_v16 }
 0x544   : > { %2087 = vmatpush3.bf16.msra.mxu1 %v2176_v48 }
 0x545   : > { %2088 = vmatprep.subr.bf16.mxu1 %v2282_v16 }
 0x548   : > { %2089 = vmatpush3.bf16.msra.mxu1 %v2177_v49 }
 0x5f5   : > { %v1417_v8 = vpop.f32.mrb[28].mxu1 }
 0x5f6   : > { %v2052_v9 = vpop.f32.mrb[29].mxu1 }
 0x5f7   : > { %v1420_v10 = vpop.f32.mrb[30].mxu1 }
 0x5f8   : > { %v2053_v11 = vpop.f32.mrb[31].mxu1 }
 0x5fd   : > { %v1509_v12 = vpop.f32.mrb[32].mxu1 }
 0x5fe   : > { %v2064_v13 = vpop.f32.mrb[33].mxu1 }
 0x5ff   : > { %v1512_v14 = vpop.f32.mrb[34].mxu1 }
 0x600   : > { %v2065_v15 = vpop.f32.mrb[35].mxu1 }
 0x605   : > { %v1371_v18 = vpop.f32.mrb[36].mxu0 }
 0x606   : > { %v1515_v19 = vadd.f32 %v1417_v8, %v1371_v18  ;;  %v2046_v20 = vpop.f32.mrb[37].mxu0 }
 0x607   : > { %v1374_v21 = vpop.f32.mrb[38].mxu0 }
 0x608   : > { %v2047_v22 = vpop.f32.mrb[39].mxu0 }
 0x60d   : > { %v1463_v23 = vpop.f32.mrb[40].mxu0 }
 0x60e   : > { %v1516_v24 = vadd.f32 %v1515_v19, %v1463_v23  ;;  %v2058_v26 = vpop.f32.mrb[41].mxu0 }
 0x60f   : > { %v1466_v27 = vpop.f32.mrb[42].mxu0 }
 0x610   : > { %v1517_v56 = vadd.f32 %v1516_v24, %v1509_v12  ;;  %v2059_v25 = vpop.f32.mrb[43].mxu0 }
 0x612   : > { %v2605_v5 = vadd.f32 %v1517_v56, %v2399_v0  ;;  %v2169_v0 = vld [vmem:[%s2714_s7 + $0x8] sm:$0xff]  }
 0x613   : > { %2069 = vmatpush3.bf16.msra.mxu0 %v2169_v0 }
 0x614   : > { %v1519_v17 = vsel %vm376_vm0, %v2605_v5, 0.0 }
 0x615   : > { %1520 = vadd.xlane.f32.xlu0 %v1519_v17 }
 0x6a2   : > { %v1521_v28 = vpop.xlane.xlu0 %1520 }
 0x6a3   : > { %v1522_v29 = vmul.f32 0.03125, %v1521_v28 }
 0x6a5   : > { %v1523_v30 = vsub.f32 %v2605_v5, %v1522_v29 }
 0x6a7   : > { %v1524_v31 = vmul.f32 %v1523_v30, %v1523_v30 }
 0x6a9   : > { %v1525_v32 = vsel %vm376_vm0, %v1524_v31, 0.0 }
 0x6aa   : > { %1526 = vadd.xlane.f32.xlu1 %v1525_v32 }
 0x737   : > { %v1527_v37 = vpop.xlane.xlu1 %1526 }
 0x738   : > { %v1528_v38 = vmul.f32 0.03125, %v1527_v37 }
 0x73a   : > { %v1529_v39 = vadd.f32 1e-05, %v1528_v38 }
 0x73c   : > { %2198 = vrsqrt.f32 %v1529_v39 }
 0x746   : > { %v2199_v40 = vpop.eup %2198 }
 0x747   : > { %v1531_v42 = vmul.f32 %v2199_v40, %v1523_v30 }
 0x749   : > { %v1538_v43 = vmul.f32 %v1854_v41, %v1531_v42 }
 0x74b   : > { %v1539_v44 = vpack.c.bf16 %v1538_v43, %v1538_v43 }
 0x74d   : > { %2071 = vmatmul.mubr.msk.bf16.vlgmr.msra.gmra.mrb[44].mxu0 %vm376_vm0, %v1539_v44 }
 0x820   : > { %v1593_v50 = vpop.f32.mrb[44].mxu0 }
 0x821   : > { %v1600_v51 = vmul.f32 0.70710677, %v1593_v50  ;;  %v2072_v52 = vpop.f32.mrb[45].mxu0  ;;  %v1599_v57 = vmul.f32 0.5, %v1593_v50 }
 0x822   : > { %v1596_v53 = vpop.f32.mrb[46].mxu0 }
 0x823   : > { %2200 = verf.f32 %v1600_v51  ;;  %v2073_v54 = vpop.f32.mrb[47].mxu0 }
 0x82d   : > { %v2201_v55 = vpop.eup %2200 }
 0x82e   : > { %v1602_v58 = vadd.f32 1.0, %v2201_v55 }
 0x830   : > { %v1603_v59 = vmul.f32 %v1602_v58, %v1599_v57 }
 0x832   : > { %v1604_v60 = vpack.c.bf16 %v1603_v59, %v1603_v59 }
 0x834   : > { %2091 = vmatmul.mubr.bf16.vlgmr.msra.gmra.mrb[36].mxu1 %v1604_v60 }
 0x907   : > { %v1703_v16 = vpop.f32.mrb[36].mxu1 }
 0x908   : > { %v1709_v61 = vadd.f32 %v1703_v16, %v2605_v5  ;;  %v2092_v62 = vpop.f32.mrb[37].mxu1 }
 0x909   : > { %v1706_v63 = vpop.f32.mrb[38].mxu1 }
 0x90a   : > { %v2093_v1 = vpop.f32.mrb[39].mxu1  ;;  %1710 = vst.msk [vmem:[%s358_s20] sm:$0xff] %vm376_vm0, %v1709_v61 }
 0x90b   : > { %2215 = shalt.err (!%p2212_p5)
}
 0x90c   : > { %s2216_s15 = scalar_lea.hbm %s2659_s26, 128  ;;  %s2220_s24 = scalar_lea.hbm %s2716_s9, 256 }
 0x90d   : > { %p2217_p6 = scmp.ne.s32.totalorder %s2659_s26, %s2216_s15  ;;  %p2221_p10 = scmp.lt.u32.totalorder %s2659_s26, %s2716_s9 }
 0x90e   : > { %p2222_p11 = scmp.lt.u32.totalorder %s2220_s24, %s2216_s15  ;;  %p2224_p13 = scmp.lt.u32.totalorder %s2216_s15, %s2659_s26 }
 0x90f   : > { %p2218_p7 = pnand %p2217_p6, %p2376_p4 }
 0x910   : > { %p2223_p12 = por %p2222_p11, %p2221_p10 }
 0x911   : > { %p2219_p9 = pneg %p2218_p7 }
 0x912   : > { %p2225_p0 = por %p2224_p13, %p2223_p12 }
 0x914   : > { %p2226_p1 = pnand %p2225_p0, %p2219_p9 }
 0x916   : > { %2229 = shalt.err (!%p2226_p1)
}
 0x917   : > { %2094 = dma.vmem_to_hbm [thread:$0]  (%p2376_p4), %s2661_s23, 128, %s2659_s26, %s1712_s12  }
 0x918 PF: > { %p2100_p2 = scmp.ge.s32.totalorder %s2280_s14, 2  ;;  %s1738_s27 = sand.u32 1, %s2260_s30  }
 0x919   : > { %s1739_s29 = scalar_lea.sflag [#allocation3], %s1738_s27 }
 0x91a   : > { %p2097_p3 = pnand %p2100_p2, %p2383_p8 }
 0x91c   : > { %2255 = dma.done.wait (!%p2097_p3), %s1739_s29, 128  }
 0x91d   : > { %2257 = vsyncadd (!%p2097_p3), %s1739_s29, 4294967168  ;;  %s22_s14 = sadd.s32 1, %s2280_s14   ;;  %s2719_s30 = smov %s2264_s10 }
 0x91e   : > { %p19_p5 = scmp.ge.s32.totalorder %s22_s14, 4   ;;  %s2720_s10 = smov %s2268_s11 }
 0x91f   : > { %s2721_s11 = smov %s2389_s22  ;;  %s2722_s12 = smov %s2276_s13 }
 0x920   : > { %s2723_s13 = smov %s2725_s17  ;;  %21 = sbr.rel (!%p19_p5) target bundleno = 4 (0x4), region = 94 }
 0x927   :  { %1744 = vsyncpa [#allocation3], 1 }
 0x928   :  { %1746 = vsyncpa [#allocation3 + $0x1], 1 }

</bundles_post_ra>
